<compile_context>
chip_gen: v6e
topology: v6e:2x2x1
jax: 0.10.0
libtpu: 0.0.40
codegen_flags: <defaults>
</compile_context>

<pallas_src>
import functools

import jax
import jax.numpy as jnp
from jax.experimental import pallas as pl
from jax.experimental.pallas import tpu as pltpu

_LANE = 128        # vreg lane width; feature dims padded to a multiple of this
_NEG_SLOPE = 0.01  # nn.LeakyReLU default negative_slope


def _round_up(n, m):
    return ((n + m - 1) // m) * m


def _num_tensorcores():
    """2 TensorCores on v7x-class parts, 1 on v5e/v6e. Best-effort query."""
    try:
        kind = jax.devices()[0].device_kind.lower()
    except Exception:
        return 1
    return 2 if "v7" in kind else 1


def _vmem_cap_bytes():
    """Physical VMEM minus ~8 MiB headroom; fallback to the smallest (v7x)."""
    try:
        cap = int(pltpu.get_tpu_info().vmem_capacity_bytes)
    except Exception:
        cap = 64 * 1024 * 1024
    return max(cap - 8 * 1024 * 1024, 16 * 1024 * 1024)


def _make_const_spec_factory():
    """Constant-index-map BlockSpec (weights DMA'd once).  Single-buffered
    (pl.Buffered(1)) when the installed JAX supports pipeline_mode, so the
    weights are not reserved twice in VMEM."""
    if hasattr(pl, "Buffered"):
        try:
            # Probe the constructor once at import time.
            pl.BlockSpec((8, 128), lambda i: (0, 0), pipeline_mode=pl.Buffered(1))

            def make(shape):
                return pl.BlockSpec(shape, lambda i: (0,) * len(shape),
                                    pipeline_mode=pl.Buffered(1))
            return make, 1
        except TypeError:
            pass

    def make(shape):
        return pl.BlockSpec(shape, lambda i: (0,) * len(shape))
    return make, 2


_CONST_SPEC, _WEIGHT_BUFFERS = _make_const_spec_factory()


def _sae_kernel(x_ref,
                w1_ref, b1_ref, w2_ref, b2_ref, w3_ref, b3_ref,   # encoder
                w4_ref, b4_ref, w5_ref, b5_ref, w6_ref, b6_ref,   # decoder
                enc_ref, rec_ref):
    """Fused forward for one batch tile: 6 MXU matmuls + activations.

    Matmul operands are bf16 (MXU fast path); accumulation and all
    element-wise math (bias add, ReLU, LeakyReLU, sigmoid) stay in f32.
    """
    x = x_ref[...]                                     # bf16 [tb, xp]

    def dense(a_bf16, w_ref, b_ref):
        acc = jnp.dot(a_bf16, w_ref[...], preferred_element_type=jnp.float32)
        return acc + b_ref[...]                        # f32; bias is (1, N)

    # ---- Encoder: Linear -> ReLU -> Linear -> ReLU -> Linear ----
    h = jnp.maximum(dense(x, w1_ref, b1_ref), 0.0)
    h = jnp.maximum(dense(h.astype(jnp.bfloat16), w2_ref, b2_ref), 0.0)
    z = dense(h.astype(jnp.bfloat16), w3_ref, b3_ref)

    # LeakyReLU (negative_slope = 0.01): max(z, 0.01*z) since slope < 1.
    enc = jnp.maximum(z, _NEG_SLOPE * z)
    enc_ref[...] = enc.astype(enc_ref.dtype)

    # ---- Decoder: Linear -> ReLU -> Linear -> ReLU -> Linear ----
    d = jnp.maximum(dense(enc.astype(jnp.bfloat16), w4_ref, b4_ref), 0.0)
    d = jnp.maximum(dense(d.astype(jnp.bfloat16), w5_ref, b5_ref), 0.0)
    r = dense(d.astype(jnp.bfloat16), w6_ref, b6_ref)

    # Sigmoid via a single EUP push: sigmoid(r) = 0.5 * tanh(0.5 r) + 0.5.
    rec = 0.5 * jnp.tanh(0.5 * r) + 0.5
    rec_ref[...] = rec.astype(rec_ref.dtype)


def prepare_params(params):
    """One-time padding + bf16 cast of the weights (hoisted out of the
    per-call path).  Call once and reuse the result for every forward.

    Returns (padded_params_dict, z_dim)."""
    x_dim, h_dim = params["w1"].shape
    z_dim = params["w3"].shape[1]
    xp = _round_up(x_dim, _LANE)
    hp = _round_up(h_dim, _LANE)
    zp = _round_up(z_dim, _LANE)

    def pad_w(w, rp, cp):
        w = jnp.pad(w, ((0, rp - w.shape[0]), (0, cp - w.shape[1])))
        return w.astype(jnp.bfloat16)          # bf16 MXU operands (f32 accumulate)

    def pad_b(b, cp):
        return jnp.pad(b, (0, cp - b.shape[0])).reshape(1, cp).astype(jnp.float32)

    padded = {
        "w1": pad_w(params["w1"], xp, hp), "b1": pad_b(params["b1"], hp),
        "w2": pad_w(params["w2"], hp, hp), "b2": pad_b(params["b2"], hp),
        "w3": pad_w(params["w3"], hp, zp), "b3": pad_b(params["b3"], zp),
        "w4": pad_w(params["w4"], zp, hp), "b4": pad_b(params["b4"], hp),
        "w5": pad_w(params["w5"], hp, hp), "b5": pad_b(params["b5"], hp),
        "w6": pad_w(params["w6"], hp, xp), "b6": pad_b(params["b6"], xp),
    }
    return padded, int(z_dim)


@functools.partial(jax.jit, static_argnames=("z_dim", "tb", "out_dtype"))
def sparse_autoencoder_forward(x, padded, *, z_dim, tb=256, out_dtype=jnp.bfloat16):
    """Fused SparseAutoEncoder forward.

    x: [B, x_dim] float32.  padded: output of prepare_params().
    Returns (enc [B, z_dim], rec [B, x_dim]) in `out_dtype` (bf16 by default to
    halve the HBM store traffic; cast outside if f32 is needed downstream).

    tb: batch-tile rows (multiple of 128).  256 is a good default; on v6e with
    large B, 512-1024 gives fewer, bigger tiles (128 MiB VMEM easily fits them).
    """
    B, x_dim = x.shape
    w1p, w2p, w3p = padded["w1"], padded["w2"], padded["w3"]
    w4p, w5p, w6p = padded["w4"], padded["w5"], padded["w6"]
    xp, hp = w1p.shape
    zp = w3p.shape[1]

    # ---- Batch tiling: no garbage tiles on single-TC chips; on v7x split real
    # rows across both TensorCores when the batch would otherwise fit one tile.
    n_cores = _num_tensorcores()
    tb_eff = max(_LANE, min(_round_up(tb, _LANE), _round_up(B, _LANE)))
    if n_cores >= 2 and B > _LANE and pl.cdiv(B, tb_eff) < 2:
        tb_eff = _round_up(pl.cdiv(B, 2), _LANE)
    num_tiles = pl.cdiv(B, tb_eff)          # note: odd counts leave a 1-tile
    Bp = num_tiles * tb_eff                 # imbalance on v7x for large B.

    bf16 = jnp.bfloat16
    x_p = jnp.pad(x, ((0, Bp - B), (0, xp - x_dim))).astype(bf16)

    x_spec = pl.BlockSpec((tb_eff, xp), lambda i: (i, 0))
    enc_spec = pl.BlockSpec((tb_eff, zp), lambda i: (i, 0))
    rec_spec = pl.BlockSpec((tb_eff, xp), lambda i: (i, 0))

    in_specs = [
        x_spec,
        _CONST_SPEC(w1p.shape), _CONST_SPEC(padded["b1"].shape),
        _CONST_SPEC(w2p.shape), _CONST_SPEC(padded["b2"].shape),
        _CONST_SPEC(w3p.shape), _CONST_SPEC(padded["b3"].shape),
        _CONST_SPEC(w4p.shape), _CONST_SPEC(padded["b4"].shape),
        _CONST_SPEC(w5p.shape), _CONST_SPEC(padded["b5"].shape),
        _CONST_SPEC(w6p.shape), _CONST_SPEC(padded["b6"].shape),
    ]

    # ---- VMEM budget: 1x weights (Buffered(1)) + 1x biases + double-buffered
    # I/O tiles + f32 temporaries + slack, capped under physical VMEM.
    out_itemsize = jnp.dtype(out_dtype).itemsize
    w_bytes = 2 * (w1p.size + w2p.size + w3p.size + w4p.size + w5p.size + w6p.size)
    b_bytes = 4 * sum(padded[k].size for k in ("b1", "b2", "b3", "b4", "b5", "b6"))
    io_bytes = 2 * tb_eff * (2 * xp + out_itemsize * (zp + xp))   # 2-deep x/enc/rec
    tmp_bytes = 6 * tb_eff * max(hp, xp, zp) * 4                  # in-kernel f32 temps
    vmem_needed = (_WEIGHT_BUFFERS * (w_bytes + b_bytes)
                   + io_bytes + tmp_bytes + (4 << 20))
    vmem_limit = int(min(max(vmem_needed, 16 << 20), _vmem_cap_bytes()))
    # TODO(synk): if h_dim is so large that w_bytes alone nears the v7x cap,
    # add a grid axis over the N dimension of the two hp x hp layers.

    flops = 2 * Bp * (xp * hp + hp * hp + hp * zp + zp * hp + hp * hp + hp * xp)
    cost = pl.CostEstimate(
        flops=int(flops),
        transcendentals=int(Bp * xp),                  # one tanh per rec element
        bytes_accessed=int(Bp * xp * 2 + w_bytes + b_bytes
                           + Bp * (zp + xp) * out_itemsize),
    )

    enc_p, rec_p = pl.pallas_call(
        _sae_kernel,
        out_shape=(
            jax.ShapeDtypeStruct((Bp, zp), out_dtype),
            jax.ShapeDtypeStruct((Bp, xp), out_dtype),
        ),
        grid_spec=pltpu.PrefetchScalarGridSpec(
            num_scalar_prefetch=0,
            grid=(num_tiles,),
            in_specs=in_specs,
            out_specs=[enc_spec, rec_spec],
        ),
        compiler_params=pltpu.CompilerParams(
            dimension_semantics=("parallel",),
            vmem_limit_bytes=vmem_limit,
        ),
        cost_estimate=cost,
    )(x_p,
      padded["w1"], padded["b1"], padded["w2"], padded["b2"],
      padded["w3"], padded["b3"], padded["w4"], padded["b4"],
      padded["w5"], padded["b5"], padded["w6"], padded["b6"])

    return enc_p[:B, :z_dim], rec_p[:B, :x_dim]


def init_params(key, x_dim, h_dim, z_dim):
    """Deterministic init mimicking nn.Linear default: U(-1/sqrt(fan_in), +)."""
    def linear(key, fan_in, fan_out):
        kw, kb = jax.random.split(key)
        bound = 1.0 / jnp.sqrt(fan_in)
        w = jax.random.uniform(kw, (fan_in, fan_out), jnp.float32, -bound, bound)
        b = jax.random.uniform(kb, (fan_out,), jnp.float32, -bound, bound)
        return w, b

    keys = jax.random.split(key, 6)
    params = {}
    # Encoder: x_dim -> h_dim -> h_dim -> z_dim
    params["w1"], params["b1"] = linear(keys[0], x_dim, h_dim)
    params["w2"], params["b2"] = linear(keys[1], h_dim, h_dim)
    params["w3"], params["b3"] = linear(keys[2], h_dim, z_dim)
    # Decoder: z_dim -> h_dim -> h_dim -> x_dim
    params["w4"], params["b4"] = linear(keys[3], z_dim, h_dim)
    params["w5"], params["b5"] = linear(keys[4], h_dim, h_dim)
    params["w6"], params["b6"] = linear(keys[5], h_dim, x_dim)
    return params


def reference_forward(x, params):
    """Pure-JAX f32 reference of the PyTorch forward (is_disc=rec_disc=False)."""
    h = jnp.maximum(x @ params["w1"] + params["b1"], 0.0)
    h = jnp.maximum(h @ params["w2"] + params["b2"], 0.0)
    z = h @ params["w3"] + params["b3"]
    enc = jnp.where(z >= 0.0, z, _NEG_SLOPE * z)
    d = jnp.maximum(enc @ params["w4"] + params["b4"], 0.0)
    d = jnp.maximum(d @ params["w5"] + params["b5"], 0.0)
    r = d @ params["w6"] + params["b6"]
    rec = jax.nn.sigmoid(r)
    return enc, rec


if __name__ == "__main__":
    key = jax.random.PRNGKey(0)
    B, x_dim, h_dim, z_dim = 16, 64, 32, 16

    kx, kp = jax.random.split(key)
    x = jax.random.normal(kx, (B, x_dim), jnp.float32)
    params = init_params(kp, x_dim, h_dim, z_dim)

    # One-time pad + bf16 cast of the weights (reused across calls).
    padded, z_dim_static = prepare_params(params)
    padded = jax.block_until_ready(padded)

    enc, rec = sparse_autoencoder_forward(x, padded, z_dim=z_dim_static, tb=256)
    enc, rec = jax.block_until_ready(enc), jax.block_until_ready(rec)

    enc_ref, rec_ref = reference_forward(x, params)
    assert enc.shape == (B, z_dim) and rec.shape == (B, x_dim)
    # bf16 matmul operands + bf16 output storage => loose tolerance vs f32 ref.
    enc_f32 = enc.astype(jnp.float32)
    rec_f32 = rec.astype(jnp.float32)
    assert jnp.allclose(enc_f32, enc_ref, atol=5e-2, rtol=5e-2)
    assert jnp.allclose(rec_f32, rec_ref, atol=5e-2, rtol=5e-2)

    print("KERNEL_OK")
</pallas_src>

<mosaic_0001>
module attributes {stable_mosaic.version = 11 : i64} {
  func.func @_sae_kernel(%arg0: i32, %arg1: memref<128x128xbf16, #tpu.memory_space<vmem>>, %arg2: memref<128x128xbf16, #tpu.memory_space<vmem>>, %arg3: memref<1x128xf32, #tpu.memory_space<vmem>>, %arg4: memref<128x128xbf16, #tpu.memory_space<vmem>>, %arg5: memref<1x128xf32, #tpu.memory_space<vmem>>, %arg6: memref<128x128xbf16, #tpu.memory_space<vmem>>, %arg7: memref<1x128xf32, #tpu.memory_space<vmem>>, %arg8: memref<128x128xbf16, #tpu.memory_space<vmem>>, %arg9: memref<1x128xf32, #tpu.memory_space<vmem>>, %arg10: memref<128x128xbf16, #tpu.memory_space<vmem>>, %arg11: memref<1x128xf32, #tpu.memory_space<vmem>>, %arg12: memref<128x128xbf16, #tpu.memory_space<vmem>>, %arg13: memref<1x128xf32, #tpu.memory_space<vmem>>, %arg14: memref<128x128xbf16, #tpu.memory_space<vmem>>, %arg15: memref<128x128xbf16, #tpu.memory_space<vmem>>) attributes {dimension_semantics = [#tpu.dimension_semantics<parallel>], iteration_bounds = array<i64: 1>, scalar_prefetch = 0 : i64, scratch_operands = 0 : i64, tpu.core_type = #tpu.core_type<tc>, window_params = [{transform_indices = @transform_0, window_bounds = array<i64: 128, 128>}, {pipeline_mode = #tpu.pipeline_mode<synchronous>, transform_indices = @transform_1, window_bounds = array<i64: 128, 128>}, {pipeline_mode = #tpu.pipeline_mode<synchronous>, transform_indices = @transform_2, window_bounds = array<i64: 1, 128>}, {pipeline_mode = #tpu.pipeline_mode<synchronous>, transform_indices = @transform_3, window_bounds = array<i64: 128, 128>}, {pipeline_mode = #tpu.pipeline_mode<synchronous>, transform_indices = @transform_4, window_bounds = array<i64: 1, 128>}, {pipeline_mode = #tpu.pipeline_mode<synchronous>, transform_indices = @transform_5, window_bounds = array<i64: 128, 128>}, {pipeline_mode = #tpu.pipeline_mode<synchronous>, transform_indices = @transform_6, window_bounds = array<i64: 1, 128>}, {pipeline_mode = #tpu.pipeline_mode<synchronous>, transform_indices = @transform_7, window_bounds = array<i64: 128, 128>}, {pipeline_mode = #tpu.pipeline_mode<synchronous>, transform_indices = @transform_8, window_bounds = array<i64: 1, 128>}, {pipeline_mode = #tpu.pipeline_mode<synchronous>, transform_indices = @transform_9, window_bounds = array<i64: 128, 128>}, {pipeline_mode = #tpu.pipeline_mode<synchronous>, transform_indices = @transform_10, window_bounds = array<i64: 1, 128>}, {pipeline_mode = #tpu.pipeline_mode<synchronous>, transform_indices = @transform_11, window_bounds = array<i64: 128, 128>}, {pipeline_mode = #tpu.pipeline_mode<synchronous>, transform_indices = @transform_12, window_bounds = array<i64: 1, 128>}, {transform_indices = @transform_13, window_bounds = array<i64: 128, 128>}, {transform_indices = @transform_14, window_bounds = array<i64: 128, 128>}]} {
    %c0 = arith.constant 0 : index
    %c0_0 = arith.constant 0 : index
    %0 = vector.load %arg1[%c0, %c0_0] : memref<128x128xbf16, #tpu.memory_space<vmem>>, vector<128x128xbf16>
    %c0_1 = arith.constant 0 : index
    %c0_2 = arith.constant 0 : index
    %1 = vector.load %arg2[%c0_1, %c0_2] : memref<128x128xbf16, #tpu.memory_space<vmem>>, vector<128x128xbf16>
    %cst = arith.constant dense<0.000000e+00> : vector<128x128xf32>
    %2 = tpu.matmul %0, %1, %cst {dimension_numbers = #tpu.dot_dimension_numbers<[1], [0], [0], [1], [0, 0, 1, 1], [], []>} : vector<128x128xbf16>, vector<128x128xbf16>, vector<128x128xf32> -> vector<128x128xf32>
    %c0_3 = arith.constant 0 : index
    %c0_4 = arith.constant 0 : index
    %3 = vector.load %arg3[%c0_3, %c0_4] : memref<1x128xf32, #tpu.memory_space<vmem>>, vector<1x128xf32>
    %4 = vector.broadcast %3 : vector<1x128xf32> to vector<128x128xf32>
    %5 = arith.addf %2, %4 : vector<128x128xf32>
    %cst_5 = arith.constant 0.000000e+00 : f32
    %6 = vector.broadcast %cst_5 : f32 to vector<128x128xf32>
    %7 = arith.maximumf %5, %6 : vector<128x128xf32>
    %8 = arith.truncf %7 : vector<128x128xf32> to vector<128x128xbf16>
    %c0_6 = arith.constant 0 : index
    %c0_7 = arith.constant 0 : index
    %9 = vector.load %arg4[%c0_6, %c0_7] : memref<128x128xbf16, #tpu.memory_space<vmem>>, vector<128x128xbf16>
    %cst_8 = arith.constant dense<0.000000e+00> : vector<128x128xf32>
    %10 = tpu.matmul %8, %9, %cst_8 {dimension_numbers = #tpu.dot_dimension_numbers<[1], [0], [0], [1], [0, 0, 1, 1], [], []>} : vector<128x128xbf16>, vector<128x128xbf16>, vector<128x128xf32> -> vector<128x128xf32>
    %c0_9 = arith.constant 0 : index
    %c0_10 = arith.constant 0 : index
    %11 = vector.load %arg5[%c0_9, %c0_10] : memref<1x128xf32, #tpu.memory_space<vmem>>, vector<1x128xf32>
    %12 = vector.broadcast %11 : vector<1x128xf32> to vector<128x128xf32>
    %13 = arith.addf %10, %12 : vector<128x128xf32>
    %cst_11 = arith.constant 0.000000e+00 : f32
    %14 = vector.broadcast %cst_11 : f32 to vector<128x128xf32>
    %15 = arith.maximumf %13, %14 : vector<128x128xf32>
    %16 = arith.truncf %15 : vector<128x128xf32> to vector<128x128xbf16>
    %c0_12 = arith.constant 0 : index
    %c0_13 = arith.constant 0 : index
    %17 = vector.load %arg6[%c0_12, %c0_13] : memref<128x128xbf16, #tpu.memory_space<vmem>>, vector<128x128xbf16>
    %cst_14 = arith.constant dense<0.000000e+00> : vector<128x128xf32>
    %18 = tpu.matmul %16, %17, %cst_14 {dimension_numbers = #tpu.dot_dimension_numbers<[1], [0], [0], [1], [0, 0, 1, 1], [], []>} : vector<128x128xbf16>, vector<128x128xbf16>, vector<128x128xf32> -> vector<128x128xf32>
    %c0_15 = arith.constant 0 : index
    %c0_16 = arith.constant 0 : index
    %19 = vector.load %arg7[%c0_15, %c0_16] : memref<1x128xf32, #tpu.memory_space<vmem>>, vector<1x128xf32>
    %20 = vector.broadcast %19 : vector<1x128xf32> to vector<128x128xf32>
    %21 = arith.addf %18, %20 : vector<128x128xf32>
    %cst_17 = arith.constant 0.00999999977 : f32
    %22 = vector.broadcast %cst_17 : f32 to vector<128x128xf32>
    %23 = arith.mulf %22, %21 : vector<128x128xf32>
    %24 = arith.maximumf %21, %23 : vector<128x128xf32>
    %25 = arith.truncf %24 : vector<128x128xf32> to vector<128x128xbf16>
    %c0_18 = arith.constant 0 : index
    %c0_19 = arith.constant 0 : index
    %26 = vector.load %arg14[%c0_18, %c0_19] : memref<128x128xbf16, #tpu.memory_space<vmem>>, vector<128x128xbf16>
    tpu.vector_store %arg14[%c0_18, %c0_19], %25 {strides = array<i32>} : memref<128x128xbf16, #tpu.memory_space<vmem>>, vector<128x128xbf16>,
    %27 = arith.truncf %24 : vector<128x128xf32> to vector<128x128xbf16>
    %c0_20 = arith.constant 0 : index
    %c0_21 = arith.constant 0 : index
    %28 = vector.load %arg8[%c0_20, %c0_21] : memref<128x128xbf16, #tpu.memory_space<vmem>>, vector<128x128xbf16>
    %cst_22 = arith.constant dense<0.000000e+00> : vector<128x128xf32>
    %29 = tpu.matmul %27, %28, %cst_22 {dimension_numbers = #tpu.dot_dimension_numbers<[1], [0], [0], [1], [0, 0, 1, 1], [], []>} : vector<128x128xbf16>, vector<128x128xbf16>, vector<128x128xf32> -> vector<128x128xf32>
    %c0_23 = arith.constant 0 : index
    %c0_24 = arith.constant 0 : index
    %30 = vector.load %arg9[%c0_23, %c0_24] : memref<1x128xf32, #tpu.memory_space<vmem>>, vector<1x128xf32>
    %31 = vector.broadcast %30 : vector<1x128xf32> to vector<128x128xf32>
    %32 = arith.addf %29, %31 : vector<128x128xf32>
    %cst_25 = arith.constant 0.000000e+00 : f32
    %33 = vector.broadcast %cst_25 : f32 to vector<128x128xf32>
    %34 = arith.maximumf %32, %33 : vector<128x128xf32>
    %35 = arith.truncf %34 : vector<128x128xf32> to vector<128x128xbf16>
    %c0_26 = arith.constant 0 : index
    %c0_27 = arith.constant 0 : index
    %36 = vector.load %arg10[%c0_26, %c0_27] : memref<128x128xbf16, #tpu.memory_space<vmem>>, vector<128x128xbf16>
    %cst_28 = arith.constant dense<0.000000e+00> : vector<128x128xf32>
    %37 = tpu.matmul %35, %36, %cst_28 {dimension_numbers = #tpu.dot_dimension_numbers<[1], [0], [0], [1], [0, 0, 1, 1], [], []>} : vector<128x128xbf16>, vector<128x128xbf16>, vector<128x128xf32> -> vector<128x128xf32>
    %c0_29 = arith.constant 0 : index
    %c0_30 = arith.constant 0 : index
    %38 = vector.load %arg11[%c0_29, %c0_30] : memref<1x128xf32, #tpu.memory_space<vmem>>, vector<1x128xf32>
    %39 = vector.broadcast %38 : vector<1x128xf32> to vector<128x128xf32>
    %40 = arith.addf %37, %39 : vector<128x128xf32>
    %cst_31 = arith.constant 0.000000e+00 : f32
    %41 = vector.broadcast %cst_31 : f32 to vector<128x128xf32>
    %42 = arith.maximumf %40, %41 : vector<128x128xf32>
    %43 = arith.truncf %42 : vector<128x128xf32> to vector<128x128xbf16>
    %c0_32 = arith.constant 0 : index
    %c0_33 = arith.constant 0 : index
    %44 = vector.load %arg12[%c0_32, %c0_33] : memref<128x128xbf16, #tpu.memory_space<vmem>>, vector<128x128xbf16>
    %cst_34 = arith.constant dense<0.000000e+00> : vector<128x128xf32>
    %45 = tpu.matmul %43, %44, %cst_34 {dimension_numbers = #tpu.dot_dimension_numbers<[1], [0], [0], [1], [0, 0, 1, 1], [], []>} : vector<128x128xbf16>, vector<128x128xbf16>, vector<128x128xf32> -> vector<128x128xf32>
    %c0_35 = arith.constant 0 : index
    %c0_36 = arith.constant 0 : index
    %46 = vector.load %arg13[%c0_35, %c0_36] : memref<1x128xf32, #tpu.memory_space<vmem>>, vector<1x128xf32>
    %47 = vector.broadcast %46 : vector<1x128xf32> to vector<128x128xf32>
    %48 = arith.addf %45, %47 : vector<128x128xf32>
    %cst_37 = arith.constant 5.000000e-01 : f32
    %49 = vector.broadcast %cst_37 : f32 to vector<128x128xf32>
    %50 = arith.mulf %49, %48 : vector<128x128xf32>
    %51 = math.tanh %50 : vector<128x128xf32>
    %cst_38 = arith.constant 5.000000e-01 : f32
    %52 = vector.broadcast %cst_38 : f32 to vector<128x128xf32>
    %53 = arith.mulf %52, %51 : vector<128x128xf32>
    %cst_39 = arith.constant 5.000000e-01 : f32
    %54 = vector.broadcast %cst_39 : f32 to vector<128x128xf32>
    %55 = arith.addf %53, %54 : vector<128x128xf32>
    %56 = arith.truncf %55 : vector<128x128xf32> to vector<128x128xbf16>
    %c0_40 = arith.constant 0 : index
    %c0_41 = arith.constant 0 : index
    %57 = vector.load %arg15[%c0_40, %c0_41] : memref<128x128xbf16, #tpu.memory_space<vmem>>, vector<128x128xbf16>
    tpu.vector_store %arg15[%c0_40, %c0_41], %56 {strides = array<i32>} : memref<128x128xbf16, #tpu.memory_space<vmem>>, vector<128x128xbf16>,
    return
  }
  func.func @transform_0(%arg0: i32) -> (i32, i32) {
    %c0_i32 = arith.constant 0 : i32
    %c0_i32_0 = arith.constant 0 : i32
    return %arg0, %c0_i32 : i32, i32
  }
  func.func @transform_1(%arg0: i32) -> (i32, i32) {
    %c0_i32 = arith.constant 0 : i32
    %c0_i32_0 = arith.constant 0 : i32
    %c0_i32_1 = arith.constant 0 : i32
    return %c0_i32, %c0_i32_0 : i32, i32
  }
  func.func @transform_2(%arg0: i32) -> (i32, i32) {
    %c0_i32 = arith.constant 0 : i32
    %c0_i32_0 = arith.constant 0 : i32
    %c0_i32_1 = arith.constant 0 : i32
    return %c0_i32, %c0_i32_0 : i32, i32
  }
  func.func @transform_3(%arg0: i32) -> (i32, i32) {
    %c0_i32 = arith.constant 0 : i32
    %c0_i32_0 = arith.constant 0 : i32
    %c0_i32_1 = arith.constant 0 : i32
    return %c0_i32, %c0_i32_0 : i32, i32
  }
  func.func @transform_4(%arg0: i32) -> (i32, i32) {
    %c0_i32 = arith.constant 0 : i32
    %c0_i32_0 = arith.constant 0 : i32
    %c0_i32_1 = arith.constant 0 : i32
    return %c0_i32, %c0_i32_0 : i32, i32
  }
  func.func @transform_5(%arg0: i32) -> (i32, i32) {
    %c0_i32 = arith.constant 0 : i32
    %c0_i32_0 = arith.constant 0 : i32
    %c0_i32_1 = arith.constant 0 : i32
    return %c0_i32, %c0_i32_0 : i32, i32
  }
  func.func @transform_6(%arg0: i32) -> (i32, i32) {
    %c0_i32 = arith.constant 0 : i32
    %c0_i32_0 = arith.constant 0 : i32
    %c0_i32_1 = arith.constant 0 : i32
    return %c0_i32, %c0_i32_0 : i32, i32
  }
  func.func @transform_7(%arg0: i32) -> (i32, i32) {
    %c0_i32 = arith.constant 0 : i32
    %c0_i32_0 = arith.constant 0 : i32
    %c0_i32_1 = arith.constant 0 : i32
    return %c0_i32, %c0_i32_0 : i32, i32
  }
  func.func @transform_8(%arg0: i32) -> (i32, i32) {
    %c0_i32 = arith.constant 0 : i32
    %c0_i32_0 = arith.constant 0 : i32
    %c0_i32_1 = arith.constant 0 : i32
    return %c0_i32, %c0_i32_0 : i32, i32
  }
  func.func @transform_9(%arg0: i32) -> (i32, i32) {
    %c0_i32 = arith.constant 0 : i32
    %c0_i32_0 = arith.constant 0 : i32
    %c0_i32_1 = arith.constant 0 : i32
    return %c0_i32, %c0_i32_0 : i32, i32
  }
  func.func @transform_10(%arg0: i32) -> (i32, i32) {
    %c0_i32 = arith.constant 0 : i32
    %c0_i32_0 = arith.constant 0 : i32
    %c0_i32_1 = arith.constant 0 : i32
    return %c0_i32, %c0_i32_0 : i32, i32
  }
  func.func @transform_11(%arg0: i32) -> (i32, i32) {
    %c0_i32 = arith.constant 0 : i32
    %c0_i32_0 = arith.constant 0 : i32
    %c0_i32_1 = arith.constant 0 : i32
    return %c0_i32, %c0_i32_0 : i32, i32
  }
  func.func @transform_12(%arg0: i32) -> (i32, i32) {
    %c0_i32 = arith.constant 0 : i32
    %c0_i32_0 = arith.constant 0 : i32
    %c0_i32_1 = arith.constant 0 : i32
    return %c0_i32, %c0_i32_0 : i32, i32
  }
  func.func @transform_13(%arg0: i32) -> (i32, i32) {
    %c0_i32 = arith.constant 0 : i32
    %c0_i32_0 = arith.constant 0 : i32
    return %arg0, %c0_i32 : i32, i32
  }
  func.func @transform_14(%arg0: i32) -> (i32, i32) {
    %c0_i32 = arith.constant 0 : i32
    %c0_i32_0 = arith.constant 0 : i32
    return %arg0, %c0_i32 : i32, i32
  }
}

</mosaic_0001>

<bundles_post_ra>
// kernel: sparse_autoencoder_forward.1
= control target key start
LH: loop header
LB: loop body
LE: loop exit
PB: predicated region body
PF: predicated region fallthrough
CT: control target
= control target key end

     0   :  { %20 = vsyncpa [#allocation3], 0  ;;  %s2521_s0 = inlined_call_operand.vmem [shape: bf16[128,128], index: 0, kind: input, shape index: {}]   ;;  %s2522_s1 = inlined_call_operand.vmem [shape: bf16[128,128], index: 1, kind: input, shape index: {}]   ;;  %s2523_s2 = inlined_call_operand.vmem [shape: f32[1,128], index: 2, kind: input, shape index: {}]   ;;  %s2524_s3 = inlined_call_operand.hbm [shape: bf16[128,128], index: 3, kind: input, shape index: {}]   ;;  %s2525_s4 = inlined_call_operand.vmem [shape: f32[1,128], index: 4, kind: input, shape index: {}]   ;;  %s2526_s5 = inlined_call_operand.hbm [shape: bf16[128,128], index: 5, kind: input, shape index: {}]   ;;  %s2527_s6 = inlined_call_operand.vmem [shape: f32[1,128], index: 6, kind: input, shape index: {}]   ;;  %s2528_s7 = inlined_call_operand.hbm [shape: bf16[128,128], index: 7, kind: input, shape index: {}]   ;;  %s2529_s8 = inlined_call_operand.vmem [shape: f32[1,128], index: 8, kind: input, shape index: {}]   ;;  %s2530_s9 = inlined_call_operand.hbm [shape: bf16[128,128], index: 9, kind: input, shape index: {}]   ;;  %s2531_s10 = inlined_call_operand.vmem [shape: f32[1,128], index: 10, kind: input, shape index: {}]   ;;  %s2532_s11 = inlined_call_operand.hbm [shape: bf16[128,128], index: 11, kind: input, shape index: {}]   ;;  %s2533_s12 = inlined_call_operand.vmem [shape: f32[1,128], index: 12, kind: input, shape index: {}]   ;;  %s2534_s13 = inlined_call_operand.vmem [shape: bf16[128,128], index: 13, kind: output, shape index: {0}]   ;;  %s2535_s14 = inlined_call_operand.vmem [shape: bf16[128,128], index: 14, kind: output, shape index: {1}]  }
   0x1   :  { %21 = vsyncpa [#allocation5], 0 }
   0x2   :  { %22 = vsyncpa [#allocation8], 0  ;;  %s2259_s29 = smov [#allocation4]   ;;  %s2260_s15 = smov [#allocation7]  }
   0x3   :  { %s48_s30 = sshll.u32 %s2259_s29, 4  ;;  %s76_s16 = sshll.u32 %s2260_s15, 4  ;;  %s49_s30 = int_to_ptr.vmem [resolvable:$true] %s48_s30  ;;  %s77_s16 = int_to_ptr.vmem [resolvable:$true] %s76_s16 }
   0x4   :  { %s2161_s17 = scalar_lea.vmem %s49_s30, 1024  ;;  %p2166_p1 = scmp.lt.s32.totalorder %s49_s30, %s49_s30 }
   0x5   :  { %p2162_p0 = scmp.ne.s32.totalorder %s49_s30, %s2161_s17  ;;  %p2167_p2 = scmp.lt.s32.totalorder %s2161_s17, %s2161_s17 }
   0x7   :  { %p2168_p3 = por %p2167_p2, %p2166_p1 }
   0x9   :  { %p2169_p4 = pnand %p2168_p3, %p2162_p0 }
   0xb   :  { %2172 = shalt.err (!%p2169_p4)
}
   0xc   :  { %s2261_s18 = smov 64   ;;  %s2262_s19 = smov 4  }
   0xd   :  { %54 = dma.hbm_to_vmem [thread:$0]  %s2526_s5, 1024, %s49_s30, [#allocation5], %s2261_s18, %s2261_s18, %s2262_s19  }
   0xe   :  { %s2181_s22 = scalar_lea.vmem %s77_s16, 1024  ;;  %p2186_p6 = scmp.lt.s32.totalorder %s77_s16, %s77_s16 }
   0xf   :  { %p2182_p5 = scmp.ne.s32.totalorder %s77_s16, %s2181_s22  ;;  %p2187_p7 = scmp.lt.s32.totalorder %s2181_s22, %s2181_s22 }
  0x11   :  { %p2188_p8 = por %p2187_p7, %p2186_p6 }
  0x13   :  { %p2189_p9 = pnand %p2188_p8, %p2182_p5 }
  0x15   :  { %2192 = shalt.err (!%p2189_p9)
}
  0x16   :  { %82 = dma.hbm_to_vmem [thread:$0]  %s2530_s9, 1024, %s77_s16, [#allocation8], %s2261_s18, %s2261_s18, %s2262_s19  }
  0x17   :  { %s2263_s25 = smov [#allocation2]   ;;  %s2264_s27 = smov [#allocation6]  }
  0x18   :  { %s34_s26 = sshll.u32 %s2263_s25, 4  ;;  %s62_s28 = sshll.u32 %s2264_s27, 4  ;;  %s35_s26 = int_to_ptr.vmem [resolvable:$true] %s34_s26  ;;  %s63_s28 = int_to_ptr.vmem [resolvable:$true] %s62_s28 }
  0x19   :  { %s2201_s5 = scalar_lea.vmem %s35_s26, 1024  ;;  %p2206_p11 = scmp.lt.s32.totalorder %s35_s26, %s35_s26 }
  0x1a   :  { %p2202_p10 = scmp.ne.s32.totalorder %s35_s26, %s2201_s5  ;;  %p2207_p12 = scmp.lt.s32.totalorder %s2201_s5, %s2201_s5 }
  0x1c   :  { %p2208_p13 = por %p2207_p12, %p2206_p11 }
  0x1e   :  { %p2209_p0 = pnand %p2208_p13, %p2202_p10 }
  0x20   :  { %2212 = shalt.err (!%p2209_p0)
}
  0x21   :  { %40 = dma.hbm_to_vmem [thread:$0]  %s2524_s3, 1024, %s35_s26, [#allocation3], %s2261_s18, %s2261_s18, %s2262_s19  }
  0x22   :  { %s2221_s9 = scalar_lea.vmem %s63_s28, 1024  ;;  %p2226_p2 = scmp.lt.s32.totalorder %s63_s28, %s63_s28 }
  0x23   :  { %p2222_p1 = scmp.ne.s32.totalorder %s63_s28, %s2221_s9  ;;  %p2227_p3 = scmp.lt.s32.totalorder %s2221_s9, %s2221_s9 }
  0x25   :  { %p2228_p4 = por %p2227_p3, %p2226_p2 }
  0x27   :  { %p2229_p5 = pnand %p2228_p4, %p2222_p1 }
  0x29   :  { %2232 = shalt.err (!%p2229_p5)
}
  0x2a   :  { %68 = dma.hbm_to_vmem [thread:$0]  %s2528_s7, 1024, %s63_s28, [#allocation5], %s2261_s18, %s2261_s18, %s2262_s19  }
  0x2b   :  { %s2265_s17 = smov [#allocation9]  }
  0x2c   :  { %s90_s20 = sshll.u32 %s2265_s17, 4  ;;  %s91_s20 = int_to_ptr.vmem [resolvable:$true] %s90_s20 }
  0x2d   :  { %s2241_s21 = scalar_lea.vmem %s91_s20, 1024  ;;  %p2246_p7 = scmp.lt.s32.totalorder %s91_s20, %s91_s20 }
  0x2e   :  { %p2242_p6 = scmp.ne.s32.totalorder %s91_s20, %s2241_s21  ;;  %p2247_p8 = scmp.lt.s32.totalorder %s2241_s21, %s2241_s21 }
  0x30   :  { %p2248_p9 = por %p2247_p8, %p2246_p7 }
  0x32   :  { %p2249_p10 = pnand %p2248_p9, %p2242_p6 }
  0x34   :  { %2252 = shalt.err (!%p2249_p10)
}
  0x35   :  { %96 = dma.hbm_to_vmem [thread:$0]  %s2532_s11, 1024, %s91_s20, [#allocation8], %s2261_s18, %s2261_s18, %s2262_s19  }
  0x36   :  { %2253 = dma.done.wait [#allocation3], 1024  }
  0x37   :  { %2254 = vsyncadd [#allocation3], 4294966272 }
  0x38   :  { %2255 = dma.done.wait [#allocation5], 2048  }
  0x39   :  { %2256 = vsyncadd [#allocation5], 4294965248 }
  0x3a   :  { %2257 = dma.done.wait [#allocation8], 2048  }
  0x3b   :  { %2258 = vsyncadd [#allocation8], 4294965248  ;;  %v2065_v0 = vld [vmem:[%s2522_s1 + $0x38] sm:$0xff]   ;;  %v2066_v1 = vld [vmem:[%s2522_s1 + $0x30] sm:$0xff]  }
  0x3c   :  { %1866 = vmatprep.subr.bf16.mxu0 %v2065_v0  ;;  %v2067_v2 = vld [vmem:[%s2522_s1 + $0x28] sm:$0xff]   ;;  %v2068_v3 = vld [vmem:[%s2522_s1 + $0x20] sm:$0xff]   ;;  %v2069_v5 = vld [vmem:[%s2522_s1 + $0x18] sm:$0xff]  }
  0x3d   :  { %1867 = vmatpush3.bf16.msra.mxu0 %v2065_v0  ;;  %v2073_v4 = vld [vmem:[%s2521_s0] sm:$0xff]   ;;  %v2070_v6 = vld [vmem:[%s2522_s1 + $0x10] sm:$0xff]   ;;  %v2081_v7 = vld [vmem:[#allocation2 + $0x38] sm:$0xff]  }
  0x3e   :  { %1868 = vmatprep.subr.bf16.mxu0 %v2066_v1  ;;  %1882 = vmatprep.mubr.bf16.mxu0 %v2073_v4  ;;  %v2082_v8 = vld [vmem:[#allocation2 + $0x30] sm:$0xff]   ;;  %v2071_v9 = vld [vmem:[%s2522_s1 + $0x8] sm:$0xff]   ;;  %v2072_v11 = vld [vmem:[%s2522_s1] sm:$0xff]  }
  0x3f   :  { %1898 = vmatprep.subr.bf16.mxu1 %v2081_v7  ;;  %v2083_v10 = vld [vmem:[#allocation2 + $0x28] sm:$0xff]   ;;  %v2084_v12 = vld [vmem:[#allocation2 + $0x20] sm:$0xff]   ;;  %v2085_v13 = vld [vmem:[#allocation2 + $0x18] sm:$0xff]  }
  0x40   :  { %1899 = vmatpush3.bf16.msra.mxu1 %v2081_v7  ;;  %v2074_v14 = vld [vmem:[%s2521_s0 + $0x8] sm:$0xff]   ;;  %v2075_v15 = vld [vmem:[%s2521_s0 + $0x10] sm:$0xff]   ;;  %v2076_v16 = vld [vmem:[%s2521_s0 + $0x18] sm:$0xff]  }
  0x41   :  { %1869 = vmatpush3.bf16.msra.mxu0 %v2066_v1  ;;  %1900 = vmatprep.subr.bf16.mxu1 %v2082_v8  ;;  %v2077_v17 = vld [vmem:[%s2521_s0 + $0x20] sm:$0xff]   ;;  %v2078_v18 = vld [vmem:[%s2521_s0 + $0x28] sm:$0xff]   ;;  %v2079_v19 = vld [vmem:[%s2521_s0 + $0x30] sm:$0xff]  }
  0x42   :  { %1870 = vmatprep.subr.bf16.mxu0 %v2067_v2  ;;  %v2080_v20 = vld [vmem:[%s2521_s0 + $0x38] sm:$0xff]   ;;  %v2086_v21 = vld [vmem:[#allocation2 + $0x10] sm:$0xff]   ;;  %v2087_v22 = vld [vmem:[#allocation2 + $0x8] sm:$0xff]  }
  0x43   :  { %v2088_v23 = vld [vmem:[#allocation2] sm:$0xff]   ;;  %v2089_v24 = vld [vmem:[#allocation4 + $0x38] sm:$0xff]   ;;  %v2090_v25 = vld [vmem:[#allocation4 + $0x30] sm:$0xff]  }
  0x44   :  { %1901 = vmatpush3.bf16.msra.mxu1 %v2082_v8  ;;  %v2091_v26 = vld [vmem:[#allocation4 + $0x28] sm:$0xff]   ;;  %v2092_v27 = vld [vmem:[#allocation4 + $0x20] sm:$0xff]   ;;  %v2093_v28 = vld [vmem:[#allocation4 + $0x18] sm:$0xff]  }
  0x45   :  { %1871 = vmatpush3.bf16.msra.mxu0 %v2067_v2  ;;  %1902 = vmatprep.subr.bf16.mxu1 %v2083_v10  ;;  %v1550_v31 = vld [vmem:[%s2523_s2] ss:$0 sm:$0xff] }
  0x46   :  { %1872 = vmatprep.subr.bf16.mxu0 %v2068_v3 }
  0x48   :  { %1903 = vmatpush3.bf16.msra.mxu1 %v2083_v10 }
  0x49   :  { %1873 = vmatpush3.bf16.msra.mxu0 %v2068_v3  ;;  %1904 = vmatprep.subr.bf16.mxu1 %v2084_v12 }
  0x4a   :  { %1874 = vmatprep.subr.bf16.mxu0 %v2069_v5 }
  0x4c   :  { %1905 = vmatpush3.bf16.msra.mxu1 %v2084_v12 }
  0x4d   :  { %1875 = vmatpush3.bf16.msra.mxu0 %v2069_v5  ;;  %1906 = vmatprep.subr.bf16.mxu1 %v2085_v13 }
  0x4e   :  { %1876 = vmatprep.subr.bf16.mxu0 %v2070_v6 }
  0x50   :  { %1907 = vmatpush3.bf16.msra.mxu1 %v2085_v13 }
  0x51   :  { %1877 = vmatpush3.bf16.msra.mxu0 %v2070_v6  ;;  %1908 = vmatprep.subr.bf16.mxu1 %v2086_v21 }
  0x52   :  { %1878 = vmatprep.subr.bf16.mxu0 %v2071_v9 }
  0x54   :  { %1909 = vmatpush3.bf16.msra.mxu1 %v2086_v21 }
  0x55   :  { %1879 = vmatpush3.bf16.msra.mxu0 %v2071_v9  ;;  %1910 = vmatprep.subr.bf16.mxu1 %v2087_v22 }
  0x56   :  { %1880 = vmatprep.subr.bf16.mxu0 %v2072_v11 }
  0x58   :  { %1911 = vmatpush3.bf16.msra.mxu1 %v2087_v22  ;;  %v2094_v22 = vld [vmem:[#allocation4 + $0x10] sm:$0xff]  }
  0x59   :  { %1881 = vmatpush3.bf16.msra.mxu0 %v2072_v11  ;;  %1912 = vmatprep.subr.bf16.mxu1 %v2088_v23 }
  0x5a   :  { %1930 = vmatprep.subr.bf16.mxu0 %v2089_v24 }
  0x5c   :  { %1883 = vmatmul.mubr.bf16.vlgmr.msra.gmra.mxu0 %v2074_v14  ;;  %1913 = vmatpush3.bf16.msra.mxu1 %v2088_v23  ;;  %v2095_v23 = vld [vmem:[#allocation4 + $0x8] sm:$0xff]  }
  0x5d   :  { %1886 = vmatprep.mubr.bf16.mxu0 %v2075_v15  ;;  %1931 = vmatpush3.bf16.msra.mxu0 %v2089_v24  ;;  %v2096_v24 = vld [vmem:[#allocation4] sm:$0xff]  }
  0x5e   :  { %1932 = vmatprep.subr.bf16.mxu0 %v2090_v25 }
  0x61   :  { %1933 = vmatpush3.bf16.msra.mxu0 %v2090_v25  ;;  %v2097_v25 = vld [vmem:[#allocation6 + $0x38] sm:$0xff]  }
  0x62   :  { %1934 = vmatprep.subr.bf16.mxu0 %v2091_v26  ;;  %1962 = vmatprep.subr.bf16.mxu1 %v2097_v25 }
  0x64   :  { %1887 = vmatmul.mubr.bf16.gmra.mxu0 %v2076_v16 }
  0x65   :  { %1890 = vmatprep.mubr.bf16.mxu0 %v2077_v17  ;;  %1935 = vmatpush3.bf16.msra.mxu0 %v2091_v26  ;;  %v2098_v26 = vld [vmem:[#allocation6 + $0x30] sm:$0xff]  }
  0x66   :  { %1936 = vmatprep.subr.bf16.mxu0 %v2092_v27 }
  0x69   :  { %1937 = vmatpush3.bf16.msra.mxu0 %v2092_v27  ;;  %v2099_v27 = vld [vmem:[#allocation6 + $0x28] sm:$0xff]  }
  0x6a   :  { %1938 = vmatprep.subr.bf16.mxu0 %v2093_v28 }
  0x6c   :  { %1891 = vmatmul.mubr.bf16.gmra.mxu0 %v2078_v18 }
  0x6d   :  { %1894 = vmatprep.mubr.bf16.mxu0 %v2079_v19  ;;  %1939 = vmatpush3.bf16.msra.mxu0 %v2093_v28  ;;  %v2100_v28 = vld [vmem:[#allocation6 + $0x20] sm:$0xff]  }
  0x6e   :  { %1940 = vmatprep.subr.bf16.mxu0 %v2094_v22 }
  0x71   :  { %1941 = vmatpush3.bf16.msra.mxu0 %v2094_v22 }
  0x72   :  { %1942 = vmatprep.subr.bf16.mxu0 %v2095_v23 }
  0x74   :  { %1895 = vmatmul.mubr.bf16.gmra.mxu0 %v2080_v20 }
  0x75   :  { %1943 = vmatpush3.bf16.msra.mxu0 %v2095_v23  ;;  %v2102_v23 = vld [vmem:[#allocation6 + $0x10] sm:$0xff]  }
  0x76   :  { %1944 = vmatprep.subr.bf16.mxu0 %v2096_v24 }
  0x79   :  { %1945 = vmatpush3.bf16.msra.mxu0 %v2096_v24  ;;  %v2103_v24 = vld [vmem:[#allocation6 + $0x8] sm:$0xff]  }
 0x11c   :  { %v1884_v29 = vpop.f32.mrf.mxu0 }
 0x11d   :  { %v293_v35 = vadd.f32 %v1884_v29, %v1550_v31  ;;  %v2101_v29 = vld [vmem:[#allocation6 + $0x18] sm:$0xff]  }
 0x11e   :  { %v284_v30 = vpop.f32.mrf.mxu0 }
 0x11f   :  { %v285_v33 = vadd.f32 %v1550_v31, %v284_v30  ;;  %v349_v42 = vmax.f32 %v293_v35, 0.0 }
 0x120   :  { %v1885_v32 = vpop.f32.mrf.mxu0 }
 0x121   :  { %v296_v34 = vadd.f32 %v1885_v32, %v1550_v31  ;;  %v347_v40 = vmax.f32 %v285_v33, 0.0  ;;  %v1567_v32 = vld [vmem:[%s2525_s4] ss:$0 sm:$0xff] }
 0x122   :  { %v287_v36 = vpop.f32.mrf.mxu0 }
 0x123   :  { %v288_v37 = vadd.f32 %v1550_v31, %v287_v36  ;;  %v350_v38 = vmax.f32 %v296_v34, 0.0 }
 0x124   :  { %v1888_v39 = vpop.f32.mrf.mxu0 }
 0x125   :  { %v348_v41 = vmax.f32 %v288_v37, 0.0  ;;  %v364_v45 = vpack.c.bf16 %v350_v38, %v349_v42  ;;  %v309_v49 = vadd.f32 %v1888_v39, %v1550_v31 }
 0x126   :  { %v300_v43 = vpop.f32.mrf.mxu0 }
 0x127   :  { %v363_v44 = vpack.c.bf16 %v348_v41, %v347_v40  ;;  %v301_v47 = vadd.f32 %v1550_v31, %v300_v43  ;;  %v353_v56 = vmax.f32 %v309_v49, 0.0 }
 0x128   :  { %v1889_v46 = vpop.f32.mrf.mxu0 }
 0x129   :  { %v312_v48 = vadd.f32 %v1889_v46, %v1550_v31  ;;  %1914 = vmatprep.mubr.bf16.mxu1 %v363_v44  ;;  %v351_v54 = vmax.f32 %v301_v47, 0.0 }
 0x12a   :  { %v303_v50 = vpop.f32.mrf.mxu0  ;;  %1915 = vmatmul.mubr.bf16.vlgmr.msra.gmra.mxu1 %v364_v45 }
 0x12b   :  { %v304_v51 = vadd.f32 %v1550_v31, %v303_v50  ;;  %v354_v52 = vmax.f32 %v312_v48, 0.0  ;;  %1963 = vmatpush3.bf16.msra.mxu1 %v2097_v25  ;;  %v2104_v25 = vld [vmem:[#allocation6] sm:$0xff]  }
 0x12c   :  { %v1892_v53 = vpop.f32.mrf.mxu0  ;;  %1964 = vmatprep.subr.bf16.mxu1 %v2098_v26 }
 0x12d   :  { %v352_v55 = vmax.f32 %v304_v51, 0.0  ;;  %v366_v59 = vpack.c.bf16 %v354_v52, %v353_v56  ;;  %v325_v63 = vadd.f32 %v1892_v53, %v1550_v31 }
 0x12e   :  { %v316_v57 = vpop.f32.mrf.mxu0 }
 0x12f   :  { %v365_v58 = vpack.c.bf16 %v352_v55, %v351_v54  ;;  %v317_v61 = vadd.f32 %v1550_v31, %v316_v57  ;;  %v357_v6 = vmax.f32 %v325_v63, 0.0  ;;  %1965 = vmatpush3.bf16.msra.mxu1 %v2098_v26  ;;  %v2105_v26 = vld [vmem:[#allocation7 + $0x38] sm:$0xff]  }
 0x130   :  { %v1893_v60 = vpop.f32.mrf.mxu0  ;;  %1966 = vmatprep.subr.bf16.mxu1 %v2099_v27  ;;  %1994 = vmatprep.subr.bf16.mxu0 %v2105_v26 }
 0x131   :  { %v328_v62 = vadd.f32 %v1893_v60, %v1550_v31  ;;  %1918 = vmatprep.mubr.bf16.mxu1 %v365_v58  ;;  %v355_v4 = vmax.f32 %v317_v61, 0.0 }
 0x132   :  { %v319_v0 = vpop.f32.mrf.mxu0  ;;  %1919 = vmatmul.mubr.bf16.gmra.mxu1 %v366_v59 }
 0x133   :  { %v320_v1 = vadd.f32 %v1550_v31, %v319_v0  ;;  %v358_v2 = vmax.f32 %v328_v62, 0.0  ;;  %1967 = vmatpush3.bf16.msra.mxu1 %v2099_v27  ;;  %v2106_v27 = vld [vmem:[#allocation7 + $0x30] sm:$0xff]  }
 0x134   :  { %v1896_v3 = vpop.f32.mrf.mxu0  ;;  %1968 = vmatprep.subr.bf16.mxu1 %v2100_v28 }
 0x135   :  { %v356_v5 = vmax.f32 %v320_v1, 0.0  ;;  %v368_v9 = vpack.c.bf16 %v358_v2, %v357_v6  ;;  %v341_v13 = vadd.f32 %v1896_v3, %v1550_v31 }
 0x136   :  { %v332_v7 = vpop.f32.mrf.mxu0 }
 0x137   :  { %v367_v8 = vpack.c.bf16 %v356_v5, %v355_v4  ;;  %v333_v11 = vadd.f32 %v1550_v31, %v332_v7  ;;  %v361_v19 = vmax.f32 %v341_v13, 0.0  ;;  %1969 = vmatpush3.bf16.msra.mxu1 %v2100_v28  ;;  %v2107_v28 = vld [vmem:[#allocation7 + $0x28] sm:$0xff]  }
 0x138   :  { %v1897_v10 = vpop.f32.mrf.mxu0  ;;  %1970 = vmatprep.subr.bf16.mxu1 %v2101_v29 }
 0x139   :  { %v344_v12 = vadd.f32 %v1897_v10, %v1550_v31  ;;  %1922 = vmatprep.mubr.bf16.mxu1 %v367_v8  ;;  %v359_v17 = vmax.f32 %v333_v11, 0.0 }
 0x13a   :  { %v335_v14 = vpop.f32.mrf.mxu0  ;;  %1923 = vmatmul.mubr.bf16.gmra.mxu1 %v368_v9 }
 0x13b   :  { %v336_v15 = vadd.f32 %v1550_v31, %v335_v14  ;;  %v362_v16 = vmax.f32 %v344_v12, 0.0  ;;  %1971 = vmatpush3.bf16.msra.mxu1 %v2101_v29  ;;  %v2108_v29 = vld [vmem:[#allocation7 + $0x20] sm:$0xff]  }
 0x13c   :  { %1972 = vmatprep.subr.bf16.mxu1 %v2102_v23 }
 0x13d   :  { %v360_v18 = vmax.f32 %v336_v15, 0.0  ;;  %v370_v21 = vpack.c.bf16 %v362_v16, %v361_v19 }
 0x13f   :  { %v369_v20 = vpack.c.bf16 %v360_v18, %v359_v17  ;;  %1973 = vmatpush3.bf16.msra.mxu1 %v2102_v23 }
 0x140   :  { %1974 = vmatprep.subr.bf16.mxu1 %v2103_v24 }
 0x141   :  { %1926 = vmatprep.mubr.bf16.mxu1 %v369_v20 }
 0x142   :  { %1927 = vmatmul.mubr.bf16.gmra.mxu1 %v370_v21 }
 0x143   :  { %1975 = vmatpush3.bf16.msra.mxu1 %v2103_v24 }
 0x144   :  { %1976 = vmatprep.subr.bf16.mxu1 %v2104_v25 }
 0x147   :  { %1977 = vmatpush3.bf16.msra.mxu1 %v2104_v25 }
 0x1ea   :  { %v1916_v30 = vpop.f32.mrf.mxu1 }
 0x1eb   :  { %v485_v36 = vadd.f32 %v1916_v30, %v1567_v32  ;;  %v2109_v30 = vld [vmem:[#allocation7 + $0x18] sm:$0xff]  }
 0x1ec   :  { %v476_v31 = vpop.f32.mrf.mxu1 }
 0x1ed   :  { %v477_v34 = vadd.f32 %v1567_v32, %v476_v31  ;;  %v541_v43 = vmax.f32 %v485_v36, 0.0  ;;  %v2428_v31 = vld [vmem:[%s2527_s6] ss:$0 sm:$0xff] }
 0x1ee   :  { %v1917_v33 = vpop.f32.mrf.mxu1 }
 0x1ef   :  { %v488_v35 = vadd.f32 %v1917_v33, %v1567_v32  ;;  %v539_v41 = vmax.f32 %v477_v34, 0.0 }
 0x1f0   :  { %v479_v37 = vpop.f32.mrf.mxu1 }
 0x1f1   :  { %v480_v38 = vadd.f32 %v1567_v32, %v479_v37  ;;  %v542_v39 = vmax.f32 %v488_v35, 0.0 }
 0x1f2   :  { %v1920_v40 = vpop.f32.mrf.mxu1 }
 0x1f3   :  { %v540_v42 = vmax.f32 %v480_v38, 0.0  ;;  %v556_v46 = vpack.c.bf16 %v542_v39, %v541_v43  ;;  %v501_v50 = vadd.f32 %v1920_v40, %v1567_v32 }
 0x1f4   :  { %v492_v44 = vpop.f32.mrf.mxu1 }
 0x1f5   :  { %v555_v45 = vpack.c.bf16 %v540_v42, %v539_v41  ;;  %v493_v48 = vadd.f32 %v1567_v32, %v492_v44  ;;  %v545_v57 = vmax.f32 %v501_v50, 0.0 }
 0x1f6   :  { %v1921_v47 = vpop.f32.mrf.mxu1 }
 0x1f7   :  { %v504_v49 = vadd.f32 %v1921_v47, %v1567_v32  ;;  %1946 = vmatprep.mubr.bf16.mxu0 %v555_v45  ;;  %v543_v55 = vmax.f32 %v493_v48, 0.0 }
 0x1f8   :  { %v495_v51 = vpop.f32.mrf.mxu1  ;;  %1947 = vmatmul.mubr.bf16.vlgmr.msra.gmra.mxu0 %v556_v46 }
 0x1f9   :  { %v496_v52 = vadd.f32 %v1567_v32, %v495_v51  ;;  %v546_v53 = vmax.f32 %v504_v49, 0.0  ;;  %1995 = vmatpush3.bf16.msra.mxu0 %v2105_v26 }
 0x1fa   :  { %v1924_v54 = vpop.f32.mrf.mxu1  ;;  %1996 = vmatprep.subr.bf16.mxu0 %v2106_v27 }
 0x1fb   :  { %v544_v56 = vmax.f32 %v496_v52, 0.0  ;;  %v558_v60 = vpack.c.bf16 %v546_v53, %v545_v57  ;;  %v517_v0 = vadd.f32 %v1924_v54, %v1567_v32 }
 0x1fc   :  { %v508_v58 = vpop.f32.mrf.mxu1 }
 0x1fd   :  { %v557_v59 = vpack.c.bf16 %v544_v56, %v543_v55  ;;  %v509_v62 = vadd.f32 %v1567_v32, %v508_v58  ;;  %v549_v7 = vmax.f32 %v517_v0, 0.0  ;;  %1997 = vmatpush3.bf16.msra.mxu0 %v2106_v27 }
 0x1fe   :  { %v1925_v61 = vpop.f32.mrf.mxu1  ;;  %1998 = vmatprep.subr.bf16.mxu0 %v2107_v28 }
 0x1ff   :  { %v520_v63 = vadd.f32 %v1925_v61, %v1567_v32  ;;  %1950 = vmatprep.mubr.bf16.mxu0 %v557_v59  ;;  %v547_v5 = vmax.f32 %v509_v62, 0.0 }
 0x200   :  { %v511_v1 = vpop.f32.mrf.mxu1  ;;  %1951 = vmatmul.mubr.bf16.gmra.mxu0 %v558_v60 }
 0x201   :  { %v512_v2 = vadd.f32 %v1567_v32, %v511_v1  ;;  %v550_v3 = vmax.f32 %v520_v63, 0.0  ;;  %1999 = vmatpush3.bf16.msra.mxu0 %v2107_v28 }
 0x202   :  { %v1928_v4 = vpop.f32.mrf.mxu1  ;;  %2000 = vmatprep.subr.bf16.mxu0 %v2108_v29 }
 0x203   :  { %v548_v6 = vmax.f32 %v512_v2, 0.0  ;;  %v560_v10 = vpack.c.bf16 %v550_v3, %v549_v7  ;;  %v533_v14 = vadd.f32 %v1928_v4, %v1567_v32 }
 0x204   :  { %v524_v8 = vpop.f32.mrf.mxu1 }
 0x205   :  { %v559_v9 = vpack.c.bf16 %v548_v6, %v547_v5  ;;  %v525_v12 = vadd.f32 %v1567_v32, %v524_v8  ;;  %v553_v20 = vmax.f32 %v533_v14, 0.0  ;;  %2001 = vmatpush3.bf16.msra.mxu0 %v2108_v29 }
 0x206   :  { %v1929_v11 = vpop.f32.mrf.mxu1  ;;  %2002 = vmatprep.subr.bf16.mxu0 %v2109_v30 }
 0x207   :  { %v536_v13 = vadd.f32 %v1929_v11, %v1567_v32  ;;  %1954 = vmatprep.mubr.bf16.mxu0 %v559_v9  ;;  %v551_v18 = vmax.f32 %v525_v12, 0.0 }
 0x208   :  { %v527_v15 = vpop.f32.mrf.mxu1  ;;  %1955 = vmatmul.mubr.bf16.gmra.mxu0 %v560_v10 }
 0x209   :  { %v528_v16 = vadd.f32 %v1567_v32, %v527_v15  ;;  %v554_v17 = vmax.f32 %v536_v13, 0.0  ;;  %2003 = vmatpush3.bf16.msra.mxu0 %v2109_v30 }
 0x20b   :  { %v552_v19 = vmax.f32 %v528_v16, 0.0  ;;  %v562_v22 = vpack.c.bf16 %v554_v17, %v553_v20 }
 0x20d   :  { %v561_v21 = vpack.c.bf16 %v552_v19, %v551_v18 }
 0x20f   :  { %1958 = vmatprep.mubr.bf16.mxu0 %v561_v21 }
 0x210   :  { %1959 = vmatmul.mubr.bf16.gmra.mxu0 %v562_v22 }
 0x2b8   :  { %v1948_v32 = vpop.f32.mrf.mxu0 }
 0x2b9   :  { %v677_v33 = vadd.f32 %v1948_v32, %v2428_v31 }
 0x2ba   :  { %v668_v34 = vpop.f32.mrf.mxu0 }
 0x2bb   :  { %v669_v35 = vadd.f32 %v2428_v31, %v668_v34  ;;  %v733_v37 = vmul.f32 0.01, %v677_v33 }
 0x2bc   :  { %v1949_v36 = vpop.f32.mrf.mxu0 }
 0x2bd   :  { %v680_v38 = vadd.f32 %v1949_v36, %v2428_v31  ;;  %v731_v40 = vmul.f32 0.01, %v669_v35  ;;  %v749_v44 = vmax.f32 %v677_v33, %v733_v37 }
 0x2be   :  { %v671_v39 = vpop.f32.mrf.mxu0 }
 0x2bf   :  { %v734_v41 = vmul.f32 0.01, %v680_v38  ;;  %v672_v42 = vadd.f32 %v2428_v31, %v671_v39  ;;  %v747_v49 = vmax.f32 %v669_v35, %v731_v40 }
 0x2c0   :  { %v1952_v43 = vpop.f32.mrf.mxu0 }
 0x2c1   :  { %v750_v45 = vmax.f32 %v680_v38, %v734_v41  ;;  %v732_v46 = vmul.f32 0.01, %v672_v42  ;;  %v693_v47 = vadd.f32 %v1952_v43, %v2428_v31  ;;  %v2111_v41 = vld [vmem:[#allocation7 + $0x8] sm:$0xff]   ;;  %v2113_v43 = vld [vmem:[#allocation9 + $0x38] sm:$0xff]  }
 0x2c2   :  { %v684_v48 = vpop.f32.mrf.mxu0  ;;  %2026 = vmatprep.subr.bf16.mxu1 %v2113_v43 }
 0x2c3   :  { %v764_v50 = vpack.c.bf16 %v750_v45, %v749_v44  ;;  %v748_v51 = vmax.f32 %v672_v42, %v732_v46  ;;  %v685_v52 = vadd.f32 %v2428_v31, %v684_v48  ;;  %v737_v54 = vmul.f32 0.01, %v693_v47  ;;  %v2112_v42 = vld [vmem:[#allocation7] sm:$0xff]   ;;  %v2114_v44 = vld [vmem:[#allocation9 + $0x30] sm:$0xff]   ;;  %v2115_v45 = vld [vmem:[#allocation9 + $0x28] sm:$0xff]  }
 0x2c4   :  { %v1953_v53 = vpop.f32.mrf.mxu0  ;;  %v2116_v46 = vld [vmem:[#allocation9 + $0x20] sm:$0xff]  }
 0x2c5   :  { %1756 = vst [vmem:[%s2534_s13 + $0x8] sm:$0xff] %v764_v50   ;;  %v696_v55 = vadd.f32 %v1953_v53, %v2428_v31  ;;  %v763_v56 = vpack.c.bf16 %v748_v51, %v747_v49  ;;  %v735_v58 = vmul.f32 0.01, %v685_v52  ;;  %v753_v62 = vmax.f32 %v693_v47, %v737_v54  ;;  %v2117_v47 = vld [vmem:[#allocation9 + $0x18] sm:$0xff]  }
 0x2c6   :  { %v687_v57 = vpop.f32.mrf.mxu0 }
 0x2c7   :  { %v738_v59 = vmul.f32 0.01, %v696_v55  ;;  %v688_v60 = vadd.f32 %v2428_v31, %v687_v57  ;;  %1680 = vst [vmem:[%s2534_s13] sm:$0xff] %v763_v56   ;;  %1978 = vmatprep.mubr.bf16.mxu1 %v763_v56  ;;  %v751_v3 = vmax.f32 %v685_v52, %v735_v58 }
 0x2c8   :  { %v1956_v61 = vpop.f32.mrf.mxu0  ;;  %1979 = vmatmul.mubr.bf16.vlgmr.msra.gmra.mxu1 %v764_v50  ;;  %v1601_v50 = vld [vmem:[%s2529_s8] ss:$0 sm:$0xff] }
 0x2c9   :  { %v754_v63 = vmax.f32 %v696_v55, %v738_v59  ;;  %v736_v0 = vmul.f32 0.01, %v688_v60  ;;  %v709_v1 = vadd.f32 %v1956_v61, %v2428_v31  ;;  %2027 = vmatpush3.bf16.msra.mxu1 %v2113_v43  ;;  %v2120_v43 = vld [vmem:[#allocation9] sm:$0xff]  }
 0x2ca   :  { %v700_v2 = vpop.f32.mrf.mxu0  ;;  %2028 = vmatprep.subr.bf16.mxu1 %v2114_v44 }
 0x2cb   :  { %v752_v4 = vmax.f32 %v688_v60, %v736_v0  ;;  %v701_v5 = vadd.f32 %v2428_v31, %v700_v2  ;;  %v766_v6 = vpack.c.bf16 %v754_v63, %v753_v62  ;;  %v741_v8 = vmul.f32 0.01, %v709_v1 }
 0x2cc   :  { %v1957_v7 = vpop.f32.mrf.mxu0 }
 0x2cd   :  { %v712_v9 = vadd.f32 %v1957_v7, %v2428_v31  ;;  %v765_v10 = vpack.c.bf16 %v752_v4, %v751_v3  ;;  %1758 = vst [vmem:[%s2534_s13 + $0x18] sm:$0xff] %v766_v6   ;;  %v739_v12 = vmul.f32 0.01, %v701_v5  ;;  %v757_v16 = vmax.f32 %v709_v1, %v741_v8  ;;  %2029 = vmatpush3.bf16.msra.mxu1 %v2114_v44 }
 0x2ce   :  { %v703_v11 = vpop.f32.mrf.mxu0  ;;  %2030 = vmatprep.subr.bf16.mxu1 %v2115_v45 }
 0x2cf   :  { %v742_v13 = vmul.f32 0.01, %v712_v9  ;;  %v704_v14 = vadd.f32 %v2428_v31, %v703_v11  ;;  %1757 = vst [vmem:[%s2534_s13 + $0x10] sm:$0xff] %v765_v10   ;;  %1982 = vmatprep.mubr.bf16.mxu1 %v765_v10  ;;  %v755_v21 = vmax.f32 %v701_v5, %v739_v12 }
 0x2d0   :  { %v1960_v15 = vpop.f32.mrf.mxu0  ;;  %1983 = vmatmul.mubr.bf16.gmra.mxu1 %v766_v6 }
 0x2d1   :  { %v758_v17 = vmax.f32 %v712_v9, %v742_v13  ;;  %v740_v18 = vmul.f32 0.01, %v704_v14  ;;  %v725_v19 = vadd.f32 %v1960_v15, %v2428_v31  ;;  %2031 = vmatpush3.bf16.msra.mxu1 %v2115_v45 }
 0x2d2   :  { %v716_v20 = vpop.f32.mrf.mxu0  ;;  %2032 = vmatprep.subr.bf16.mxu1 %v2116_v46 }
 0x2d3   :  { %v756_v22 = vmax.f32 %v704_v14, %v740_v18  ;;  %v717_v23 = vadd.f32 %v2428_v31, %v716_v20  ;;  %v768_v24 = vpack.c.bf16 %v758_v17, %v757_v16  ;;  %v745_v26 = vmul.f32 0.01, %v725_v19 }
 0x2d4   :  { %v1961_v25 = vpop.f32.mrf.mxu0 }
 0x2d5   :  { %v728_v27 = vadd.f32 %v1961_v25, %v2428_v31  ;;  %v767_v28 = vpack.c.bf16 %v756_v22, %v755_v21  ;;  %1760 = vst [vmem:[%s2534_s13 + $0x28] sm:$0xff] %v768_v24   ;;  %v743_v30 = vmul.f32 0.01, %v717_v23  ;;  %v761_v34 = vmax.f32 %v725_v19, %v745_v26  ;;  %2033 = vmatpush3.bf16.msra.mxu1 %v2116_v46  ;;  %v1610_v46 = vld [vmem:[%s2531_s10] ss:$0 sm:$0xff] }
 0x2d6   :  { %v719_v29 = vpop.f32.mrf.mxu0  ;;  %2034 = vmatprep.subr.bf16.mxu1 %v2117_v47 }
 0x2d7   :  { %v746_v32 = vmul.f32 0.01, %v728_v27  ;;  %v720_v33 = vadd.f32 %v2428_v31, %v719_v29  ;;  %1759 = vst [vmem:[%s2534_s13 + $0x20] sm:$0xff] %v767_v28   ;;  %1986 = vmatprep.mubr.bf16.mxu1 %v767_v28  ;;  %v759_v37 = vmax.f32 %v717_v23, %v743_v30  ;;  %v2110_v31 = vld [vmem:[#allocation7 + $0x10] sm:$0xff]  }
 0x2d8   :  { %1987 = vmatmul.mubr.bf16.gmra.mxu1 %v768_v24  ;;  %2004 = vmatprep.subr.bf16.mxu0 %v2110_v31 }
 0x2d9   :  { %v762_v35 = vmax.f32 %v728_v27, %v746_v32  ;;  %v744_v36 = vmul.f32 0.01, %v720_v33  ;;  %2005 = vmatpush3.bf16.msra.mxu0 %v2110_v31  ;;  %2035 = vmatpush3.bf16.msra.mxu1 %v2117_v47 }
 0x2da   :  { %2006 = vmatprep.subr.bf16.mxu0 %v2111_v41 }
 0x2db   :  { %v760_v38 = vmax.f32 %v720_v33, %v744_v36  ;;  %v770_v39 = vpack.c.bf16 %v762_v35, %v761_v34 }
 0x2dd   :  { %v769_v40 = vpack.c.bf16 %v760_v38, %v759_v37  ;;  %1762 = vst [vmem:[%s2534_s13 + $0x38] sm:$0xff] %v770_v39   ;;  %2007 = vmatpush3.bf16.msra.mxu0 %v2111_v41  ;;  %v2118_v41 = vld [vmem:[#allocation9 + $0x10] sm:$0xff]  }
 0x2de   :  { %2008 = vmatprep.subr.bf16.mxu0 %v2112_v42  ;;  %2036 = vmatprep.subr.bf16.mxu1 %v2118_v41 }
 0x2df   :  { %1761 = vst [vmem:[%s2534_s13 + $0x30] sm:$0xff] %v769_v40   ;;  %1990 = vmatprep.mubr.bf16.mxu1 %v769_v40  ;;  %2037 = vmatpush3.bf16.msra.mxu1 %v2118_v41 }
 0x2e0   :  { %1991 = vmatmul.mubr.bf16.gmra.mxu1 %v770_v39 }
 0x2e1   :  { %2009 = vmatpush3.bf16.msra.mxu0 %v2112_v42  ;;  %v2119_v42 = vld [vmem:[#allocation9 + $0x8] sm:$0xff]  }
 0x2e2   :  { %2038 = vmatprep.subr.bf16.mxu1 %v2119_v42 }
 0x2e3   :  { %2039 = vmatpush3.bf16.msra.mxu1 %v2119_v42 }
 0x2e4   :  { %2040 = vmatprep.subr.bf16.mxu1 %v2120_v43 }
 0x2e7   :  { %2041 = vmatpush3.bf16.msra.mxu1 %v2120_v43 }
 0x388   :  { %v1980_v48 = vpop.f32.mrf.mxu1 }
 0x389   :  { %v957_v54 = vadd.f32 %v1980_v48, %v1601_v50 }
 0x38a   :  { %v948_v49 = vpop.f32.mrf.mxu1 }
 0x38b   :  { %v949_v52 = vadd.f32 %v1601_v50, %v948_v49  ;;  %v1013_v61 = vmax.f32 %v957_v54, 0.0 }
 0x38c   :  { %v1981_v51 = vpop.f32.mrf.mxu1 }
 0x38d   :  { %v960_v53 = vadd.f32 %v1981_v51, %v1601_v50  ;;  %v1011_v59 = vmax.f32 %v949_v52, 0.0 }
 0x38e   :  { %v951_v55 = vpop.f32.mrf.mxu1 }
 0x38f   :  { %v952_v56 = vadd.f32 %v1601_v50, %v951_v55  ;;  %v1014_v57 = vmax.f32 %v960_v53, 0.0 }
 0x390   :  { %v1984_v58 = vpop.f32.mrf.mxu1 }
 0x391   :  { %v1012_v60 = vmax.f32 %v952_v56, 0.0  ;;  %v1028_v0 = vpack.c.bf16 %v1014_v57, %v1013_v61  ;;  %v973_v4 = vadd.f32 %v1984_v58, %v1601_v50 }
 0x392   :  { %v964_v62 = vpop.f32.mrf.mxu1 }
 0x393   :  { %v1027_v63 = vpack.c.bf16 %v1012_v60, %v1011_v59  ;;  %v965_v2 = vadd.f32 %v1601_v50, %v964_v62  ;;  %v1017_v11 = vmax.f32 %v973_v4, 0.0 }
 0x394   :  { %v1985_v1 = vpop.f32.mrf.mxu1 }
 0x395   :  { %v976_v3 = vadd.f32 %v1985_v1, %v1601_v50  ;;  %2010 = vmatprep.mubr.bf16.mxu0 %v1027_v63  ;;  %v1015_v9 = vmax.f32 %v965_v2, 0.0 }
 0x396   :  { %v967_v5 = vpop.f32.mrf.mxu1  ;;  %2011 = vmatmul.mubr.bf16.vlgmr.msra.gmra.mxu0 %v1028_v0 }
 0x397   :  { %v968_v6 = vadd.f32 %v1601_v50, %v967_v5  ;;  %v1018_v7 = vmax.f32 %v976_v3, 0.0 }
 0x398   :  { %v1988_v8 = vpop.f32.mrf.mxu1 }
 0x399   :  { %v1016_v10 = vmax.f32 %v968_v6, 0.0  ;;  %v1030_v14 = vpack.c.bf16 %v1018_v7, %v1017_v11  ;;  %v989_v18 = vadd.f32 %v1988_v8, %v1601_v50 }
 0x39a   :  { %v980_v12 = vpop.f32.mrf.mxu1 }
 0x39b   :  { %v1029_v13 = vpack.c.bf16 %v1016_v10, %v1015_v9  ;;  %v981_v16 = vadd.f32 %v1601_v50, %v980_v12  ;;  %v1021_v25 = vmax.f32 %v989_v18, 0.0 }
 0x39c   :  { %v1989_v15 = vpop.f32.mrf.mxu1 }
 0x39d   :  { %v992_v17 = vadd.f32 %v1989_v15, %v1601_v50  ;;  %2014 = vmatprep.mubr.bf16.mxu0 %v1029_v13  ;;  %v1019_v23 = vmax.f32 %v981_v16, 0.0 }
 0x39e   :  { %v983_v19 = vpop.f32.mrf.mxu1  ;;  %2015 = vmatmul.mubr.bf16.gmra.mxu0 %v1030_v14 }
 0x39f   :  { %v984_v20 = vadd.f32 %v1601_v50, %v983_v19  ;;  %v1022_v21 = vmax.f32 %v992_v17, 0.0 }
 0x3a0   :  { %v1992_v22 = vpop.f32.mrf.mxu1 }
 0x3a1   :  { %v1020_v24 = vmax.f32 %v984_v20, 0.0  ;;  %v1032_v28 = vpack.c.bf16 %v1022_v21, %v1021_v25  ;;  %v1005_v33 = vadd.f32 %v1992_v22, %v1601_v50 }
 0x3a2   :  { %v996_v26 = vpop.f32.mrf.mxu1 }
 0x3a3   :  { %v1031_v27 = vpack.c.bf16 %v1020_v24, %v1019_v23  ;;  %v997_v30 = vadd.f32 %v1601_v50, %v996_v26  ;;  %v1025_v39 = vmax.f32 %v1005_v33, 0.0 }
 0x3a4   :  { %v1993_v29 = vpop.f32.mrf.mxu1 }
 0x3a5   :  { %v1008_v32 = vadd.f32 %v1993_v29, %v1601_v50  ;;  %2018 = vmatprep.mubr.bf16.mxu0 %v1031_v27  ;;  %v1023_v37 = vmax.f32 %v997_v30, 0.0 }
 0x3a6   :  { %v999_v34 = vpop.f32.mrf.mxu1  ;;  %2019 = vmatmul.mubr.bf16.gmra.mxu0 %v1032_v28 }
 0x3a7   :  { %v1000_v35 = vadd.f32 %v1601_v50, %v999_v34  ;;  %v1026_v36 = vmax.f32 %v1008_v32, 0.0 }
 0x3a9   :  { %v1024_v38 = vmax.f32 %v1000_v35, 0.0  ;;  %v1034_v31 = vpack.c.bf16 %v1026_v36, %v1025_v39 }
 0x3ab   :  { %v1033_v40 = vpack.c.bf16 %v1024_v38, %v1023_v37  ;;  %v2479_v38 = vld [vmem:[%s2533_s12] ss:$0 sm:$0xff] }
 0x3ad   :  { %2022 = vmatprep.mubr.bf16.mxu0 %v1033_v40 }
 0x3ae   :  { %2023 = vmatmul.mubr.bf16.gmra.mxu0 %v1034_v31 }
 0x456   :  { %v2012_v44 = vpop.f32.mrf.mxu0 }
 0x457   :  { %v1149_v50 = vadd.f32 %v2012_v44, %v1610_v46 }
 0x458   :  { %v1140_v45 = vpop.f32.mrf.mxu0 }
 0x459   :  { %v1141_v48 = vadd.f32 %v1610_v46, %v1140_v45  ;;  %v1205_v57 = vmax.f32 %v1149_v50, 0.0 }
 0x45a   :  { %v2013_v47 = vpop.f32.mrf.mxu0 }
 0x45b   :  { %v1152_v49 = vadd.f32 %v2013_v47, %v1610_v46  ;;  %v1203_v55 = vmax.f32 %v1141_v48, 0.0 }
 0x45c   :  { %v1143_v51 = vpop.f32.mrf.mxu0 }
 0x45d   :  { %v1144_v52 = vadd.f32 %v1610_v46, %v1143_v51  ;;  %v1206_v53 = vmax.f32 %v1152_v49, 0.0 }
 0x45e   :  { %v2016_v54 = vpop.f32.mrf.mxu0 }
 0x45f   :  { %v1204_v56 = vmax.f32 %v1144_v52, 0.0  ;;  %v1220_v60 = vpack.c.bf16 %v1206_v53, %v1205_v57  ;;  %v1165_v0 = vadd.f32 %v2016_v54, %v1610_v46 }
 0x460   :  { %v1156_v58 = vpop.f32.mrf.mxu0 }
 0x461   :  { %v1219_v59 = vpack.c.bf16 %v1204_v56, %v1203_v55  ;;  %v1157_v62 = vadd.f32 %v1610_v46, %v1156_v58  ;;  %v1209_v7 = vmax.f32 %v1165_v0, 0.0 }
 0x462   :  { %v2017_v61 = vpop.f32.mrf.mxu0 }
 0x463   :  { %v1168_v63 = vadd.f32 %v2017_v61, %v1610_v46  ;;  %2042 = vmatprep.mubr.bf16.mxu1 %v1219_v59  ;;  %v1207_v5 = vmax.f32 %v1157_v62, 0.0 }
 0x464   :  { %v1159_v1 = vpop.f32.mrf.mxu0  ;;  %2043 = vmatmul.mubr.bf16.vlgmr.msra.gmra.mxu1 %v1220_v60 }
 0x465   :  { %v1160_v2 = vadd.f32 %v1610_v46, %v1159_v1  ;;  %v1210_v3 = vmax.f32 %v1168_v63, 0.0 }
 0x466   :  { %v2020_v4 = vpop.f32.mrf.mxu0 }
 0x467   :  { %v1208_v6 = vmax.f32 %v1160_v2, 0.0  ;;  %v1222_v10 = vpack.c.bf16 %v1210_v3, %v1209_v7  ;;  %v1181_v14 = vadd.f32 %v2020_v4, %v1610_v46 }
 0x468   :  { %v1172_v8 = vpop.f32.mrf.mxu0 }
 0x469   :  { %v1221_v9 = vpack.c.bf16 %v1208_v6, %v1207_v5  ;;  %v1173_v12 = vadd.f32 %v1610_v46, %v1172_v8  ;;  %v1213_v21 = vmax.f32 %v1181_v14, 0.0 }
 0x46a   :  { %v2021_v11 = vpop.f32.mrf.mxu0 }
 0x46b   :  { %v1184_v13 = vadd.f32 %v2021_v11, %v1610_v46  ;;  %2046 = vmatprep.mubr.bf16.mxu1 %v1221_v9  ;;  %v1211_v19 = vmax.f32 %v1173_v12, 0.0 }
 0x46c   :  { %v1175_v15 = vpop.f32.mrf.mxu0  ;;  %2047 = vmatmul.mubr.bf16.gmra.mxu1 %v1222_v10 }
 0x46d   :  { %v1176_v16 = vadd.f32 %v1610_v46, %v1175_v15  ;;  %v1214_v17 = vmax.f32 %v1184_v13, 0.0 }
 0x46e   :  { %v2024_v18 = vpop.f32.mrf.mxu0 }
 0x46f   :  { %v1212_v20 = vmax.f32 %v1176_v16, 0.0  ;;  %v1224_v24 = vpack.c.bf16 %v1214_v17, %v1213_v21  ;;  %v1197_v28 = vadd.f32 %v2024_v18, %v1610_v46 }
 0x470   :  { %v1188_v22 = vpop.f32.mrf.mxu0 }
 0x471   :  { %v1223_v23 = vpack.c.bf16 %v1212_v20, %v1211_v19  ;;  %v1189_v26 = vadd.f32 %v1610_v46, %v1188_v22  ;;  %v1217_v35 = vmax.f32 %v1197_v28, 0.0 }
 0x472   :  { %v2025_v25 = vpop.f32.mrf.mxu0 }
 0x473   :  { %v1200_v27 = vadd.f32 %v2025_v25, %v1610_v46  ;;  %2050 = vmatprep.mubr.bf16.mxu1 %v1223_v23  ;;  %v1215_v33 = vmax.f32 %v1189_v26, 0.0 }
 0x474   :  { %v1191_v29 = vpop.f32.mrf.mxu0  ;;  %2051 = vmatmul.mubr.bf16.gmra.mxu1 %v1224_v24 }
 0x475   :  { %v1192_v30 = vadd.f32 %v1610_v46, %v1191_v29  ;;  %v1218_v32 = vmax.f32 %v1200_v27, 0.0 }
 0x477   :  { %v1216_v34 = vmax.f32 %v1192_v30, 0.0  ;;  %v1226_v37 = vpack.c.bf16 %v1218_v32, %v1217_v35 }
 0x479   :  { %v1225_v36 = vpack.c.bf16 %v1216_v34, %v1215_v33 }
 0x47b   :  { %2054 = vmatprep.mubr.bf16.mxu1 %v1225_v36 }
 0x47c   :  { %2055 = vmatmul.mubr.bf16.gmra.mxu1 %v1226_v37 }
 0x524   :  { %v2044_v39 = vpop.f32.mrf.mxu1 }
 0x525   :  { %v1341_v40 = vadd.f32 %v2044_v39, %v2479_v38 }
 0x526   :  { %v1332_v31 = vpop.f32.mrf.mxu1 }
 0x527   :  { %v1397_v41 = vmul.f32 0.5, %v1341_v40  ;;  %v1333_v42 = vadd.f32 %v2479_v38, %v1332_v31 }
 0x528   :  { %v2045_v43 = vpop.f32.mrf.mxu1 }
 0x529   :  { %2121 = vtanh.f32 %v1397_v41  ;;  %v1395_v44 = vmul.f32 0.5, %v1333_v42  ;;  %v1344_v45 = vadd.f32 %v2045_v43, %v2479_v38 }
 0x52a   :  { %v1335_v46 = vpop.f32.mrf.mxu1 }
 0x52b   :  { %2123 = vtanh.f32 %v1395_v44  ;;  %v1398_v47 = vmul.f32 0.5, %v1344_v45  ;;  %v1336_v48 = vadd.f32 %v2479_v38, %v1335_v46 }
 0x52c   :  { %v2048_v49 = vpop.f32.mrf.mxu1 }
 0x52d   :  { %2125 = vtanh.f32 %v1398_v47  ;;  %v1396_v50 = vmul.f32 0.5, %v1336_v48  ;;  %v1357_v51 = vadd.f32 %v2048_v49, %v2479_v38 }
 0x52e   :  { %v1348_v52 = vpop.f32.mrf.mxu1 }
 0x52f   :  { %2127 = vtanh.f32 %v1396_v50  ;;  %v1401_v53 = vmul.f32 0.5, %v1357_v51  ;;  %v1349_v54 = vadd.f32 %v2479_v38, %v1348_v52 }
 0x530   :  { %v2049_v55 = vpop.f32.mrf.mxu1 }
 0x531   :  { %2129 = vtanh.f32 %v1401_v53  ;;  %v1399_v56 = vmul.f32 0.5, %v1349_v54  ;;  %v1360_v57 = vadd.f32 %v2049_v55, %v2479_v38 }
 0x532   :  { %v1351_v58 = vpop.f32.mrf.mxu1 }
 0x533   :  { %2131 = vtanh.f32 %v1399_v56  ;;  %v1402_v59 = vmul.f32 0.5, %v1360_v57  ;;  %v1352_v60 = vadd.f32 %v2479_v38, %v1351_v58 }
 0x534   :  { %v2052_v61 = vpop.f32.mrf.mxu1 }
 0x535   :  { %2133 = vtanh.f32 %v1402_v59  ;;  %v1400_v62 = vmul.f32 0.5, %v1352_v60  ;;  %v1373_v63 = vadd.f32 %v2052_v61, %v2479_v38 }
 0x536   :  { %v2122_v0 = vpop.eup %2121  ;;  %v1364_v1 = vpop.f32.mrf.mxu1 }
 0x537   :  { %2135 = vtanh.f32 %v1400_v62  ;;  %v1405_v2 = vmul.f32 0.5, %v1373_v63  ;;  %v1365_v3 = vadd.f32 %v2479_v38, %v1364_v1  ;;  %v1429_v5 = vmul.f32 0.5, %v2122_v0 }
 0x538   :  { %v2124_v4 = vpop.eup %2123  ;;  %v2053_v6 = vpop.f32.mrf.mxu1 }
 0x539   :  { %v1403_v7 = vmul.f32 0.5, %v1365_v3  ;;  %2137 = vtanh.f32 %v1405_v2  ;;  %v1376_v9 = vadd.f32 %v2053_v6, %v2479_v38  ;;  %v1427_v11 = vmul.f32 0.5, %v2124_v4 }
 0x53a   :  { %v2126_v8 = vpop.eup %2125  ;;  %v1367_v10 = vpop.f32.mrf.mxu1  ;;  %v1445_v15 = vadd.f32 0.5, %v1429_v5 }
 0x53b   :  { %v1430_v12 = vmul.f32 0.5, %v2126_v8  ;;  %2139 = vtanh.f32 %v1403_v7  ;;  %v1368_v13 = vadd.f32 %v2479_v38, %v1367_v10  ;;  %v1406_v16 = vmul.f32 0.5, %v1376_v9 }
 0x53c   :  { %v2128_v14 = vpop.eup %2127  ;;  %v2056_v17 = vpop.f32.mrf.mxu1  ;;  %v1443_v24 = vadd.f32 0.5, %v1427_v11 }
 0x53d   :  { %v1446_v18 = vadd.f32 0.5, %v1430_v12  ;;  %v1428_v19 = vmul.f32 0.5, %v2128_v14  ;;  %v1404_v20 = vmul.f32 0.5, %v1368_v13  ;;  %v1389_v21 = vadd.f32 %v2056_v17, %v2479_v38 }
 0x53e   :  { %v2130_v22 = vpop.eup %2129  ;;  %2141 = vtanh.f32 %v1406_v16  ;;  %v1380_v23 = vpop.f32.mrf.mxu1 }
 0x53f   :  { %v1724_v25 = vpack.c.bf16 %v1446_v18, %v1445_v15  ;;  %v1444_v26 = vadd.f32 0.5, %v1428_v19  ;;  %2143 = vtanh.f32 %v1404_v20  ;;  %v1433_v28 = vmul.f32 0.5, %v2130_v22 }
 0x540   :  { %v2132_v27 = vpop.eup %2131  ;;  %v1409_v29 = vmul.f32 0.5, %v1389_v21  ;;  %v1381_v30 = vadd.f32 %v2479_v38, %v1380_v23  ;;  %v2057_v32 = vpop.f32.mrf.mxu1 }
 0x541   :  { %1763 = vst [vmem:[%s2535_s14 + $0x8] sm:$0xff] %v1724_v25   ;;  %v1719_v33 = vpack.c.bf16 %v1444_v26, %v1443_v24  ;;  %v1392_v34 = vadd.f32 %v2057_v32, %v2479_v38  ;;  %v1431_v39 = vmul.f32 0.5, %v2132_v27  ;;  %v1449_v43 = vadd.f32 0.5, %v1433_v28 }
 0x542   :  { %v2134_v35 = vpop.eup %2133  ;;  %2145 = vtanh.f32 %v1409_v29  ;;  %v1407_v36 = vmul.f32 0.5, %v1381_v30  ;;  %v1383_v37 = vpop.f32.mrf.mxu1 }
 0x543   :  { %1720 = vst [vmem:[%s2535_s14] sm:$0xff] %v1719_v33   ;;  %v1434_v40 = vmul.f32 0.5, %v2134_v35  ;;  %v1410_v31 = vmul.f32 0.5, %v1392_v34  ;;  %v1384_v41 = vadd.f32 %v2479_v38, %v1383_v37  ;;  %v1447_v48 = vadd.f32 0.5, %v1431_v39 }
 0x544   :  { %v2136_v42 = vpop.eup %2135  ;;  %2147 = vtanh.f32 %v1407_v36 }
 0x545   :  { %v1450_v44 = vadd.f32 0.5, %v1434_v40  ;;  %v1432_v45 = vmul.f32 0.5, %v2136_v42  ;;  %2149 = vtanh.f32 %v1410_v31  ;;  %v1408_v46 = vmul.f32 0.5, %v1384_v41 }
 0x546   :  { %v2138_v47 = vpop.eup %2137 }
 0x547   :  { %v1734_v49 = vpack.c.bf16 %v1450_v44, %v1449_v43  ;;  %v1448_v50 = vadd.f32 0.5, %v1432_v45  ;;  %2151 = vtanh.f32 %v1408_v46  ;;  %v1437_v53 = vmul.f32 0.5, %v2138_v47 }
 0x548   :  { %v2140_v51 = vpop.eup %2139 }
 0x549   :  { %1765 = vst [vmem:[%s2535_s14 + $0x18] sm:$0xff] %v1734_v49   ;;  %v1729_v52 = vpack.c.bf16 %v1448_v50, %v1447_v48  ;;  %v1435_v54 = vmul.f32 0.5, %v2140_v51  ;;  %v1453_v58 = vadd.f32 0.5, %v1437_v53 }
 0x54b   :  { %v2142_v38 = vpop.eup %2141  ;;  %1764 = vst [vmem:[%s2535_s14 + $0x10] sm:$0xff] %v1729_v52   ;;  %v1451_v61 = vadd.f32 0.5, %v1435_v54 }
 0x54c   :  { %v2144_v55 = vpop.eup %2143  ;;  %v1438_v56 = vmul.f32 0.5, %v2142_v38 }
 0x54d   :  { %v1436_v57 = vmul.f32 0.5, %v2144_v55 }
 0x54e   :  { %v1454_v59 = vadd.f32 0.5, %v1438_v56 }
 0x54f   :  { %v2146_v60 = vpop.eup %2145  ;;  %v1452_v62 = vadd.f32 0.5, %v1436_v57 }
 0x550   :  { %v1744_v63 = vpack.c.bf16 %v1454_v59, %v1453_v58  ;;  %v1441_v2 = vmul.f32 0.5, %v2146_v60 }
 0x551   :  { %v2148_v0 = vpop.eup %2147  ;;  %v1739_v1 = vpack.c.bf16 %v1452_v62, %v1451_v61 }
 0x552   :  { %v2150_v3 = vpop.eup %2149  ;;  %1767 = vst [vmem:[%s2535_s14 + $0x28] sm:$0xff] %v1744_v63   ;;  %v1439_v4 = vmul.f32 0.5, %v2148_v0  ;;  %v1457_v7 = vadd.f32 0.5, %v1441_v2 }
 0x553   :  { %1766 = vst [vmem:[%s2535_s14 + $0x20] sm:$0xff] %v1739_v1   ;;  %v1442_v5 = vmul.f32 0.5, %v2150_v3 }
 0x554   :  { %v2152_v6 = vpop.eup %2151  ;;  %v1455_v10 = vadd.f32 0.5, %v1439_v4 }
 0x555   :  { %v1458_v8 = vadd.f32 0.5, %v1442_v5  ;;  %v1440_v9 = vmul.f32 0.5, %v2152_v6 }
 0x557   :  { %v1754_v11 = vpack.c.bf16 %v1458_v8, %v1457_v7  ;;  %v1456_v12 = vadd.f32 0.5, %v1440_v9 }
 0x559   :  { %1769 = vst [vmem:[%s2535_s14 + $0x38] sm:$0xff] %v1754_v11   ;;  %v1749_v13 = vpack.c.bf16 %v1456_v12, %v1455_v10 }
 0x55b   :  { %1768 = vst [vmem:[%s2535_s14 + $0x30] sm:$0xff] %v1749_v13  }
 0x55c   :  { %1547 = vsyncpa [#allocation3], 1 }
 0x55d   :  { %1548 = vsyncpa [#allocation5], 1 }
 0x55e   :  { %1549 = vsyncpa [#allocation8], 1 }

</bundles_post_ra>
